<compile_context>
chip_gen: v5e
topology: v5e:2x2
jax: 0.10.0
libtpu: 0.0.40
codegen_flags: <defaults>
</compile_context>

<pallas_src>
import jax
import jax.numpy as jnp
from jax import lax
from jax.experimental import pallas as pl
from jax.experimental.pallas import tpu as pltpu

_LANE = 128   # vreg lane width
_SUB = 8      # f32 vreg sublane count (accumulator shape)


def _cdiv(a: int, b: int) -> int:
    return -(-a // b)


def _round_up(a: int, b: int) -> int:
    return _cdiv(a, b) * b


def _sublane_pack(dtype) -> int:
    """Minimum sublane multiple for a dtype's packed layout (8/16/32)."""
    return {4: 8, 2: 16, 1: 32}.get(jnp.dtype(dtype).itemsize, 8)


def hinge_loss(outputs: jax.Array, targets: jax.Array, *,
               tile_rows: int = 8192, num_cores: int = 2) -> jax.Array:
    """Pallas TPU implementation of HingeLoss.forward (mean hinge loss)."""
    assert outputs.shape == targets.shape
    n_total = int(outputs.size)
    pack = max(_sublane_pack(outputs.dtype), _sublane_pack(targets.dtype))

    # ---- lane-dense layout: (rows, 128) ---------------------------------
    # Pad only when the element count is not 128-aligned or the array is
    # tiny (< pack rows).  128-aligned inputs reshape for free (no copy);
    # ragged row counts are masked inside the kernel.
    target_total = max(_round_up(n_total, _LANE), pack * _LANE)
    pad = target_total - n_total
    flat_o = outputs.reshape(-1)
    flat_t = targets.reshape(-1)
    if pad:
        # Neutral padding: outputs=1, targets=1 -> hinge = max(1-1, 0) = 0.
        flat_o = jnp.concatenate([flat_o, jnp.ones((pad,), flat_o.dtype)])
        flat_t = jnp.concatenate([flat_t, jnp.ones((pad,), flat_t.dtype)])
    rows = target_total // _LANE
    o2 = flat_o.reshape(rows, _LANE)
    t2 = flat_t.reshape(rows, _LANE)

    # ---- tiling / 2-TensorCore split ------------------------------------
    # Shrink the tile (never drop to 1 core) when rows < num_cores*tile_rows,
    # so both v7x cores stay busy in the mid-size regime.
    tile = min(_round_up(tile_rows, pack),
               _round_up(_cdiv(rows, num_cores), pack))
    n_tiles = _cdiv(rows, tile)
    n_par = min(num_cores, n_tiles)
    steps = _cdiv(n_tiles, n_par)
    inv_n = 1.0 / float(n_total)

    isz = jnp.dtype(outputs.dtype).itemsize + jnp.dtype(targets.dtype).itemsize

    def kernel(out_ref, tgt_ref, acc_ref):
        c = pl.program_id(0)          # core / parallel axis
        i = pl.program_id(1)          # reduction step for this core

        @pl.when(i == 0)
        def _init():
            acc_ref[...] = jnp.zeros(acc_ref.shape, acc_ref.dtype)

        # Load in the caller's dtype, widen to f32 on the VPU.
        o = out_ref[...].astype(jnp.float32)
        t = 2.0 * tgt_ref[...].astype(jnp.float32) - 1.0
        hinge = jnp.maximum(1.0 - o * t, 0.0)            # (tile, 128)

        b = c * steps + i             # logical (unclamped) block index
        row_start = b * tile

        # Fast path: block fully inside the array -> pure VPU adds.
        @pl.when(row_start + tile <= rows)
        def _full():
            acc_ref[...] += jnp.sum(hinge.reshape(tile // _SUB, _SUB, _LANE),
                                    axis=0)

        # Edge / duplicate block: mask rows beyond the true extent
        # (out-of-bounds rows of a partial block hold unspecified data;
        #  fully out-of-range duplicate blocks contribute exactly zero).
        @pl.when(row_start + tile > rows)
        def _edge():
            row_id = lax.broadcasted_iota(jnp.int32, (tile, _LANE), 0)
            h = jnp.where(row_id < (rows - row_start), hinge, 0.0)
            acc_ref[...] += jnp.sum(h.reshape(tile // _SUB, _SUB, _LANE),
                                    axis=0)

        # Fold the mean's 1/N into the kernel's last step per core.
        @pl.when(i == steps - 1)
        def _fin():
            acc_ref[...] = acc_ref[...] * inv_n

    def in_map(c, i):
        # Clamp so a trailing duplicate block (when n_par*steps > n_tiles)
        # never issues an out-of-range DMA; the kernel masks it to zero.
        return (jnp.minimum(c * steps + i, n_tiles - 1), 0)

    # 2 inputs x 2 pipeline buffers per input, plus headroom.  Scoped-VMEM
    # defaults are ~16 MiB (v5e) / ~32 MiB (v6e, v7x); physical 128/128/64 MiB.
    vmem_limit = int(min(max(2 * tile * _LANE * isz + (8 << 20), 32 << 20),
                         56 << 20))

    cost = pl.CostEstimate(
        flops=6 * n_total,
        transcendentals=0,
        bytes_accessed=int(target_total * isz + n_par * _SUB * _LANE * 4),
    )

    partials = pl.pallas_call(
        kernel,
        out_shape=jax.ShapeDtypeStruct((n_par * _SUB, _LANE), jnp.float32),
        grid_spec=pltpu.PrefetchScalarGridSpec(
            num_scalar_prefetch=0,
            grid=(n_par, steps),
            in_specs=[
                pl.BlockSpec((tile, _LANE), in_map),
                pl.BlockSpec((tile, _LANE), in_map),
            ],
            # One (8,128) partial-sum block per core, resident across 'step'.
            out_specs=pl.BlockSpec((_SUB, _LANE), lambda c, i: (c, 0)),
        ),
        compiler_params=pltpu.CompilerParams(
            dimension_semantics=("parallel", "arbitrary"),
            vmem_limit_bytes=vmem_limit,
        ),
        cost_estimate=cost,
    )(o2, t2)

    # Tiny final reduce (<= 2048 floats); 1/N already applied in-kernel.
    return jnp.sum(partials, dtype=jnp.float32)


def _reference(outputs, targets):
    t = 2.0 * targets.astype(jnp.float32) - 1.0
    return jnp.mean(jnp.maximum(1.0 - outputs.astype(jnp.float32) * t, 0.0))


if __name__ == "__main__":
    key = jax.random.PRNGKey(0)
    k1, k2, k3, k4, k5, k6, k7, k8 = jax.random.split(key, 8)

    # Primary case: (batch, feat) float32, lane-aligned, 2-tile split.
    B, F = 256, 128
    outputs = jax.random.normal(k1, (B, F), dtype=jnp.float32)
    targets = jax.random.bernoulli(k2, 0.5, (B, F)).astype(jnp.float32)  # {0,1}
    loss = jax.block_until_ready(hinge_loss(outputs, targets))
    ref = _reference(outputs, targets)
    assert jnp.allclose(loss, ref, rtol=1e-5, atol=1e-6), (loss, ref)

    # 128-aligned but ragged row count: exercises the zero-copy masked edge
    # block path (rows=100, tile=56 -> second block partially out of bounds).
    o_m = jax.random.normal(k3, (100, 128), dtype=jnp.float32)
    t_m = jax.random.bernoulli(k4, 0.5, (100, 128)).astype(jnp.float32)
    loss_m = jax.block_until_ready(hinge_loss(o_m, t_m))
    ref_m = _reference(o_m, t_m)
    assert jnp.allclose(loss_m, ref_m, rtol=1e-5, atol=1e-6), (loss_m, ref_m)

    # Fully ragged tiny case: exercises the small neutral-padding path.
    o_odd = jax.random.normal(k5, (37, 5), dtype=jnp.float32)
    t_odd = jax.random.bernoulli(k6, 0.5, (37, 5)).astype(jnp.float32)
    loss_odd = jax.block_until_ready(hinge_loss(o_odd, t_odd))
    ref_odd = _reference(o_odd, t_odd)
    assert jnp.allclose(loss_odd, ref_odd, rtol=1e-5, atol=1e-6), (loss_odd, ref_odd)

    # bf16 case: exercises dtype-aware (16,128) sublane packing + VPU widen.
    o_bf = jax.random.normal(k7, (24, 128), dtype=jnp.bfloat16)
    t_bf = jax.random.bernoulli(k8, 0.5, (24, 128)).astype(jnp.bfloat16)
    loss_bf = jax.block_until_ready(hinge_loss(o_bf, t_bf))
    ref_bf = _reference(o_bf, t_bf)
    assert jnp.allclose(loss_bf, ref_bf, rtol=1e-5, atol=1e-5), (loss_bf, ref_bf)

    print("KERNEL_OK")
</pallas_src>

<mosaic_0001>
module attributes {stable_mosaic.version = 11 : i64} {
  func.func @kernel(%arg0: i32, %arg1: i32, %arg2: memref<128x128xf32, #tpu.memory_space<vmem>>, %arg3: memref<128x128xf32, #tpu.memory_space<vmem>>, %arg4: memref<8x128xf32, #tpu.memory_space<vmem>>) attributes {dimension_semantics = [#tpu.dimension_semantics<parallel>, #tpu.dimension_semantics<arbitrary>], iteration_bounds = array<i64: 2, 1>, scalar_prefetch = 0 : i64, scratch_operands = 0 : i64, tpu.core_type = #tpu.core_type<tc>, window_params = [{transform_indices = @transform_0, window_bounds = array<i64: 128, 128>}, {transform_indices = @transform_1, window_bounds = array<i64: 128, 128>}, {transform_indices = @transform_2, window_bounds = array<i64: 8, 128>}]} {
    %c0_i32 = arith.constant 0 : i32
    %0 = arith.cmpi eq, %arg1, %c0_i32 : i32
    %1 = arith.extui %0 : i1 to i32
    %c0_i32_0 = arith.constant 0 : i32
    %2 = arith.cmpi ne, %1, %c0_i32_0 : i32
    scf.if %2 {
      %cst_14 = arith.constant 0.000000e+00 : f32
      %28 = vector.broadcast %cst_14 : f32 to vector<8x128xf32>
      %c0_15 = arith.constant 0 : index
      %c0_16 = arith.constant 0 : index
      %29 = vector.load %arg4[%c0_15, %c0_16] : memref<8x128xf32, #tpu.memory_space<vmem>>, vector<8x128xf32>
      tpu.vector_store %arg4[%c0_15, %c0_16], %28 {strides = array<i32>} : memref<8x128xf32, #tpu.memory_space<vmem>>, vector<8x128xf32>,
    } else {
    }
    %c0 = arith.constant 0 : index
    %c0_1 = arith.constant 0 : index
    %3 = vector.load %arg2[%c0, %c0_1] : memref<128x128xf32, #tpu.memory_space<vmem>>, vector<128x128xf32>
    %c0_2 = arith.constant 0 : index
    %c0_3 = arith.constant 0 : index
    %4 = vector.load %arg3[%c0_2, %c0_3] : memref<128x128xf32, #tpu.memory_space<vmem>>, vector<128x128xf32>
    %cst = arith.constant 2.000000e+00 : f32
    %5 = vector.broadcast %cst : f32 to vector<128x128xf32>
    %6 = arith.mulf %5, %4 : vector<128x128xf32>
    %cst_4 = arith.constant 1.000000e+00 : f32
    %7 = vector.broadcast %cst_4 : f32 to vector<128x128xf32>
    %8 = arith.subf %6, %7 : vector<128x128xf32>
    %9 = arith.mulf %3, %8 : vector<128x128xf32>
    %cst_5 = arith.constant 1.000000e+00 : f32
    %10 = vector.broadcast %cst_5 : f32 to vector<128x128xf32>
    %11 = arith.subf %10, %9 : vector<128x128xf32>
    %cst_6 = arith.constant 0.000000e+00 : f32
    %12 = vector.broadcast %cst_6 : f32 to vector<128x128xf32>
    %13 = arith.maximumf %11, %12 : vector<128x128xf32>
    %c1_i32 = arith.constant 1 : i32
    %14 = arith.muli %arg0, %c1_i32 : i32
    %15 = arith.addi %14, %arg1 : i32
    %c128_i32 = arith.constant 128 : i32
    %16 = arith.muli %15, %c128_i32 : i32
    %c128_i32_7 = arith.constant 128 : i32
    %17 = arith.addi %16, %c128_i32_7 : i32
    %c256_i32 = arith.constant 256 : i32
    %18 = arith.cmpi sle, %17, %c256_i32 : i32
    %19 = arith.extui %18 : i1 to i32
    %c0_i32_8 = arith.constant 0 : i32
    %20 = arith.cmpi ne, %19, %c0_i32_8 : i32
    scf.if %20 {
      %c0_14 = arith.constant 0 : index
      %c0_15 = arith.constant 0 : index
      %28 = vector.load %arg4[%c0_14, %c0_15] : memref<8x128xf32, #tpu.memory_space<vmem>>, vector<8x128xf32>
      %29 = vector.shape_cast %13 : vector<128x128xf32> to vector<16x8x128xf32>
      %cst_16 = arith.constant dense<0.000000e+00> : vector<8x128xf32>
      %30 = vector.multi_reduction <add>, %29, %cst_16 [0] : vector<16x8x128xf32> to vector<8x128xf32>
      %31 = arith.addf %28, %30 : vector<8x128xf32>
      %c0_17 = arith.constant 0 : index
      %c0_18 = arith.constant 0 : index
      %32 = vector.load %arg4[%c0_17, %c0_18] : memref<8x128xf32, #tpu.memory_space<vmem>>, vector<8x128xf32>
      tpu.vector_store %arg4[%c0_17, %c0_18], %31 {strides = array<i32>} : memref<8x128xf32, #tpu.memory_space<vmem>>, vector<8x128xf32>,
    } else {
    }
    %c128_i32_9 = arith.constant 128 : i32
    %21 = arith.addi %16, %c128_i32_9 : i32
    %c256_i32_10 = arith.constant 256 : i32
    %22 = arith.cmpi sgt, %21, %c256_i32_10 : i32
    %23 = arith.extui %22 : i1 to i32
    %c0_i32_11 = arith.constant 0 : i32
    %24 = arith.cmpi ne, %23, %c0_i32_11 : i32
    scf.if %24 {
      %28 = tpu.iota {dimensions = array<i32: 0>} : vector<128x128xi32>
      %c256_i32_14 = arith.constant 256 : i32
      %29 = arith.subi %c256_i32_14, %16 : i32
      %30 = vector.broadcast %29 : i32 to vector<128x128xi32>
      %31 = arith.cmpi slt, %28, %30 : vector<128x128xi32>
      %cst_15 = arith.constant 0.000000e+00 : f32
      %32 = vector.broadcast %cst_15 : f32 to vector<128x128xf32>
      %33 = arith.select %31, %13, %32 : vector<128x128xi1>, vector<128x128xf32>
      %c0_16 = arith.constant 0 : index
      %c0_17 = arith.constant 0 : index
      %34 = vector.load %arg4[%c0_16, %c0_17] : memref<8x128xf32, #tpu.memory_space<vmem>>, vector<8x128xf32>
      %35 = vector.shape_cast %33 : vector<128x128xf32> to vector<16x8x128xf32>
      %cst_18 = arith.constant dense<0.000000e+00> : vector<8x128xf32>
      %36 = vector.multi_reduction <add>, %35, %cst_18 [0] : vector<16x8x128xf32> to vector<8x128xf32>
      %37 = arith.addf %34, %36 : vector<8x128xf32>
      %c0_19 = arith.constant 0 : index
      %c0_20 = arith.constant 0 : index
      %38 = vector.load %arg4[%c0_19, %c0_20] : memref<8x128xf32, #tpu.memory_space<vmem>>, vector<8x128xf32>
      tpu.vector_store %arg4[%c0_19, %c0_20], %37 {strides = array<i32>} : memref<8x128xf32, #tpu.memory_space<vmem>>, vector<8x128xf32>,
    } else {
    }
    %c0_i32_12 = arith.constant 0 : i32
    %25 = arith.cmpi eq, %arg1, %c0_i32_12 : i32
    %26 = arith.extui %25 : i1 to i32
    %c0_i32_13 = arith.constant 0 : i32
    %27 = arith.cmpi ne, %26, %c0_i32_13 : i32
    scf.if %27 {
      %c0_14 = arith.constant 0 : index
      %c0_15 = arith.constant 0 : index
      %28 = vector.load %arg4[%c0_14, %c0_15] : memref<8x128xf32, #tpu.memory_space<vmem>>, vector<8x128xf32>
      %cst_16 = arith.constant 3.05175781E-5 : f32
      %29 = vector.broadcast %cst_16 : f32 to vector<8x128xf32>
      %30 = arith.mulf %28, %29 : vector<8x128xf32>
      %c0_17 = arith.constant 0 : index
      %c0_18 = arith.constant 0 : index
      %31 = vector.load %arg4[%c0_17, %c0_18] : memref<8x128xf32, #tpu.memory_space<vmem>>, vector<8x128xf32>
      tpu.vector_store %arg4[%c0_17, %c0_18], %30 {strides = array<i32>} : memref<8x128xf32, #tpu.memory_space<vmem>>, vector<8x128xf32>,
    } else {
    }
    return
  }
  func.func @transform_0(%arg0: i32, %arg1: i32) -> (i32, i32) {
    %c1_i32 = arith.constant 1 : i32
    %0 = arith.muli %arg0, %c1_i32 : i32
    %1 = arith.addi %0, %arg1 : i32
    %c1_i32_0 = arith.constant 1 : i32
    %2 = arith.minsi %1, %c1_i32_0 : i32
    %c0_i32 = arith.constant 0 : i32
    %c0_i32_1 = arith.constant 0 : i32
    return %2, %c0_i32 : i32, i32
  }
  func.func @transform_1(%arg0: i32, %arg1: i32) -> (i32, i32) {
    %c1_i32 = arith.constant 1 : i32
    %0 = arith.muli %arg0, %c1_i32 : i32
    %1 = arith.addi %0, %arg1 : i32
    %c1_i32_0 = arith.constant 1 : i32
    %2 = arith.minsi %1, %c1_i32_0 : i32
    %c0_i32 = arith.constant 0 : i32
    %c0_i32_1 = arith.constant 0 : i32
    return %2, %c0_i32 : i32, i32
  }
  func.func @transform_2(%arg0: i32, %arg1: i32) -> (i32, i32) {
    %c0_i32 = arith.constant 0 : i32
    %c0_i32_0 = arith.constant 0 : i32
    return %arg0, %c0_i32 : i32, i32
  }
}

</mosaic_0001>

<bundles_post_ra>
// kernel: tpu_custom_call.1
= control target key start
LH: loop header
LB: loop body
LE: loop exit
PB: predicated region body
PF: predicated region fallthrough
CT: control target
= control target key end

     0   :  { %s1176_s0 = inlined_call_operand.hbm [shape: f32[256,128], index: 0, kind: input, shape index: {}]   ;;  %s1177_s1 = inlined_call_operand.hbm [shape: f32[256,128], index: 1, kind: input, shape index: {}]   ;;  %s1178_s2 = inlined_call_operand.hbm [shape: f32[16,128], index: 2, kind: output, shape index: {}]  }
   0x1   :  { %1182 = sst [smem:[#allocation15_spill]] %s1176_s0 }
   0x2   :  { %7 = vsyncpa [#allocation3], 0 }
   0x3   :  { %9 = vsyncpa [#allocation3 + $0x1], 0 }
   0x4   :  { %10 = vsyncpa [#allocation6], 0 }
   0x5   :  { %12 = vsyncpa [#allocation6 + $0x1], 0 }
   0x6   :  { %13 = vsyncpa [#allocation4], 0 }
   0x7   :  { %15 = vsyncpa [#allocation4 + $0x1], 0  ;;  %s905_s9 = smov 0   ;;  %s907_s10 = smov 0  }
   0x8   :  { %s909_s11 = smov 0   ;;  %s911_s12 = smov 0  }
   0x9   :  { %s913_s13 = smov 0   ;;  %s915_s14 = smov 0  }
   0xa   :  { %s917_s15 = smov 0   ;;  %s919_s16 = smov 0  }
   0xb   :  { %s921_s17 = smov 0  }
   0xc LB: > { %1183 = sst [smem:[#allocation11_spill]] %s873_s14  ;;  %s582_s18 = sadd.s32 4294967295, %s885_s17   ;;  %s885_s17 = sphi %s921_s17, %s21_s17   ;;  %s881_s16 = sphi %s919_s16, %s1196_s16   ;;  %s877_s15 = sphi %s917_s15, %s1195_s15   ;;  %s873_s14 = sphi %s915_s14, %s1194_s14   ;;  %s869_s13 = sphi %s913_s13, %s1201_s13   ;;  %s865_s12 = sphi %s911_s12, %s1200_s12   ;;  %s861_s11 = sphi %s909_s11, %s1199_s11   ;;  %s857_s10 = sphi %s907_s10, %s1198_s10   ;;  %s853_s9 = sphi %s905_s9, %s1197_s9  }
   0xd   : > { %1184 = sst [smem:[#allocation12_spill]] %s881_s16  ;;  %s583_s19 = sadd.s32 4294967294, %s885_s17  }
   0xe   : > { %s33_s20 = sadd.s32 1, %s881_s16  ;;  %p38_p0 = scmp.lt.s32.totalorder %s881_s16, 1 }
   0xf   : > { %p35_p1 = scmp.ge.s32.totalorder %s33_s20, 2  ;;  %s46_s21 = sadd.s32 1, %s873_s14 }
  0x10   : > { %s954_s22 = scalar_select %p38_p0, %s881_s16, 1 }
  0x11   : > { %s1203_s20 = smov (%p35_p1, %s33_s20), 0  ;;  %p53_p2 = scmp.ne.s32.totalorder %s873_s14, %s869_s13 }
  0x12   : > { %1185 = sst [smem:[#allocation13_spill]] %s1203_s20  ;;  %p54_p3 = scmp.eq.s32.totalorder %s885_s17, 0 }
  0x13   : > { %p41_p4 = scmp.lt.s32.totalorder %s1203_s20, 1  ;;  %p59_p5 = scmp.ne.s32.totalorder %s869_s13, %s865_s12 }
  0x14   : > { %p963_p6 = por %p54_p3, %p53_p2  ;;  %p60_p7 = scmp.eq.s32.totalorder %s582_s18, 0 }
  0x15   : > { %s42_s24 = scalar_select %p41_p4, %s1203_s20, 1 }
  0x16   : > { %p968_p8 = por %p60_p7, %p59_p5  ;;  %s101_s26 = ssub.s32 %s881_s16, %s1203_s20 }
  0x17   : > { %s43_s27 = ssub.s32 %s954_s22, %s42_s24  ;;  %p102_p9 = scmp.eq.s32.totalorder %s101_s26, 0 }
  0x18   : > { %p44_p10 = scmp.eq.s32.totalorder %s43_s27, 0  ;;  %s104_s28 = sadd.s32 1, %s861_s11 }
  0x19   : > { %s977_s29 = scalar_select %p102_p9, %s861_s11, %s104_s28  }
  0x1a   : > { %s980_s30 = scalar_select %p44_p10, %s873_s14, %s46_s21  }
  0x1b   : > { %p114_p11 = scmp.ne.s32.totalorder %s861_s11, %s857_s10  ;;  %p115_p12 = scmp.eq.s32.totalorder %s582_s18, 1 }
  0x1c   : > { %1188 = sst [smem:[#allocation14_spill]] %s980_s30  ;;  %p120_p13 = scmp.ne.s32.totalorder %s857_s10, %s853_s9 }
  0x1d   : > { %p121_p0 = scmp.eq.s32.totalorder %s583_s19, 1  ;;  %p986_p1 = por %p115_p12, %p114_p11 }
  0x1e   : > { %p585_p2 = scmp.ge.s32.totalorder %s885_s17, 2  ;;  %p638_p4 = scmp.lt.s32.totalorder %s885_s17, 2 }
  0x1f   : > { %p991_p3 = por %p121_p0, %p120_p13  ;;  %s997_s5 = sand.u32 1, %s873_s14  }
  0x20   : > { %s619_s6 = sshll.u32 %s954_s22, 7  ;;  %s586_s7 = sshll.u32 %s997_s5, 7 }
  0x21   : > { %s1191_s0 = sld [smem:[#allocation15_spill]]  ;;  %s145_s21 = scalar_lea.vmem [#allocation2], %s586_s7 }
  0x22   : > { %s156_s24 = sshll.u32 %s145_s21, 4  ;;  %p1006_p5 = pnand %p638_p4, %p963_p6  ;;  %s157_s24 = int_to_ptr.vmem [resolvable:$true] %s156_s24 }
  0x23   : > { %p592_p7 = scmp.ge.s32.totalorder %s885_s17, 1  ;;  %p189_p9 = scmp.lt.s32.totalorder %s885_s17, 3 }
  0x24   : > { %s142_s22 = scalar_lea.sflag [#allocation3], %s997_s5  ;;  %s887_s27 = smov 128  }
  0x25   : > { %s888_s28 = smov 8   ;;  %p190_p10 = pnand %p592_p7, %p189_p9 }
  0x26   : > { %s170_s23 = scalar_lea.vmem [#allocation5], %s586_s7  ;;  %s167_s20 = scalar_lea.sflag [#allocation6], %s997_s5 }
  0x27   : > { %s153_s18 = scalar_lea.hbm %s1191_s0, %s619_s6  ;;  %s181_s0 = sshll.u32 %s170_s23, 4  ;;  %s182_s0 = int_to_ptr.vmem [resolvable:$true] %s181_s0 }
  0x28   : > { %s154_s19 = sshll.u32 %s153_s18, 4  ;;  %s178_s18 = scalar_lea.hbm %s1177_s1, %s619_s6  ;;  %s155_s19 = int_to_ptr.hbm [resolvable:$true] %s154_s19 }
  0x29   : > { %630 = dma.hbm_to_vmem [thread:$0]  (!%p1006_p5), %s155_s19, 2048, %s157_s24, %s142_s22, %s887_s27, %s887_s27, %s888_s28  }
  0x2a   : > { %s179_s21 = sshll.u32 %s178_s18, 4  ;;  %193 = sbr.rel (%p190_p10) target bundleno = 170 (0xaa), region = 28  ;;  %s180_s21 = int_to_ptr.hbm [resolvable:$true] %s179_s21 }
  0x2b   : > { %633 = dma.hbm_to_vmem [thread:$0]  (!%p1006_p5), %s180_s21, 2048, %s182_s0, %s167_s20, %s887_s27, %s887_s27, %s888_s28  }
  0x2c   : > { %s195_s16 = sand.u32 (!%p190_p10), 1, %s869_s13  }
  0x2d   : > { %s593_s30 = sshll.u32 (!%p190_p10), %s195_s16, 7  ;;  %s196_s14 = scalar_lea.sflag (!%p190_p10), [#allocation3], %s195_s16 }
  0x2e   : > { %s1022_s19 = scalar_lea.vmem (!%p190_p10), [#allocation2], %s593_s30 }
  0x2f   : > { %840 = dma.done.wait (%p968_p8), %s196_s14, 2048  }
  0x30   : > { %842 = vsyncadd (%p968_p8), %s196_s14, 4294965248  ;;  %s206_s6 = scalar_lea.sflag [#allocation6], %s195_s16  ;;  %s1028_s7 = scalar_lea.vmem [#allocation5], %s593_s30 }
  0x31   : > { %844 = dma.done.wait (%p968_p8), %s206_s6, 2048  }
  0x32   : > { %846 = vsyncadd (%p968_p8), %s206_s6, 4294965248  ;;  %s233_s0 = sand.u32 1, %s857_s10   ;;  %s612_s14 = sshll.u32 %s877_s15, 7  ;;  %v889_v0 = vmov 0.0   ;;  %v265_v1 = vld [vmem:[%s1028_s7] sm:$0xff]  ;;  %v266_v2 = vld [vmem:[%s1028_s7 + $0x8] sm:$0xff] }
  0x33   : > { %s595_s16 = sshll.u32 %s233_s0, 3  ;;  %s1040_s20 = sadd.s32 128, %s612_s14  ;;  %v267_v3 = vld [vmem:[%s1028_s7 + $0x10] sm:$0xff]  ;;  %v268_v4 = vld [vmem:[%s1028_s7 + $0x18] sm:$0xff]  ;;  %v269_v5 = vld [vmem:[%s1028_s7 + $0x20] sm:$0xff]  ;;  %v281_v6 = vmul.f32 2.0, %v265_v1 }
  0x34   : > { %s1042_s25 = scalar_lea.vmem [#allocation7], %s595_s16  ;;  %v282_v7 = vmul.f32 2.0, %v266_v2  ;;  %v270_v8 = vld [vmem:[%s1028_s7 + $0x28] sm:$0xff]  ;;  %v271_v9 = vld [vmem:[%s1028_s7 + $0x30] sm:$0xff]  ;;  %v272_v10 = vld [vmem:[%s1028_s7 + $0x38] sm:$0xff]  ;;  %v283_v11 = vmul.f32 2.0, %v267_v3 }
  0x35   : > { %248 = vst [vmem:[%s1042_s25] sm:$0xff] %v889_v0  ;;  %v284_v12 = vmul.f32 2.0, %v268_v4  ;;  %v285_v13 = vmul.f32 2.0, %v269_v5  ;;  %v273_v14 = vld [vmem:[%s1028_s7 + $0x40] sm:$0xff]  ;;  %v274_v15 = vld [vmem:[%s1028_s7 + $0x48] sm:$0xff]  ;;  %v275_v16 = vld [vmem:[%s1028_s7 + $0x50] sm:$0xff]  ;;  %v286_v17 = vmul.f32 2.0, %v270_v8 }
  0x36   : > { %v287_v18 = vmul.f32 2.0, %v271_v9  ;;  %v288_v19 = vmul.f32 2.0, %v272_v10  ;;  %v276_v20 = vld [vmem:[%s1028_s7 + $0x58] sm:$0xff]  ;;  %v277_v21 = vld [vmem:[%s1028_s7 + $0x60] sm:$0xff]  ;;  %v278_v22 = vld [vmem:[%s1028_s7 + $0x68] sm:$0xff]  ;;  %v289_v23 = vmul.f32 2.0, %v273_v14 }
  0x37   : > { %v290_v24 = vmul.f32 2.0, %v274_v15  ;;  %v291_v25 = vmul.f32 2.0, %v275_v16  ;;  %v249_v26 = vld [vmem:[%s1022_s19] sm:$0xff]  ;;  %v250_v27 = vld [vmem:[%s1022_s19 + $0x8] sm:$0xff]  ;;  %v251_v28 = vld [vmem:[%s1022_s19 + $0x10] sm:$0xff]  ;;  %v292_v31 = vmul.f32 2.0, %v276_v20 }
  0x38   : > { %v279_v29 = vld [vmem:[%s1028_s7 + $0x70] sm:$0xff]  ;;  %v280_v30 = vld [vmem:[%s1028_s7 + $0x78] sm:$0xff]  ;;  %v293_v32 = vmul.f32 2.0, %v277_v21  ;;  %v294_v33 = vmul.f32 2.0, %v278_v22  ;;  %v596_v34 = vadd.f32 -1.0, %v281_v6  ;;  %v253_v36 = vld [vmem:[%s1022_s19 + $0x20] sm:$0xff] }
  0x39   : > { %v252_v35 = vld [vmem:[%s1022_s19 + $0x18] sm:$0xff]  ;;  %v254_v37 = vld [vmem:[%s1022_s19 + $0x28] sm:$0xff]  ;;  %v295_v38 = vmul.f32 2.0, %v279_v29  ;;  %v296_v39 = vmul.f32 2.0, %v280_v30  ;;  %v597_v40 = vadd.f32 -1.0, %v282_v7  ;;  %v598_v41 = vadd.f32 -1.0, %v283_v11 }
  0x3a   : > { %v255_v42 = vld [vmem:[%s1022_s19 + $0x30] sm:$0xff]  ;;  %v256_v43 = vld [vmem:[%s1022_s19 + $0x38] sm:$0xff]  ;;  %v599_v44 = vadd.f32 -1.0, %v284_v12  ;;  %v600_v45 = vadd.f32 -1.0, %v285_v13  ;;  %v601_v46 = vadd.f32 -1.0, %v286_v17  ;;  %v602_v47 = vadd.f32 -1.0, %v287_v18 }
  0x3b   : > { %v257_v48 = vld [vmem:[%s1022_s19 + $0x40] sm:$0xff]  ;;  %v258_v49 = vld [vmem:[%s1022_s19 + $0x48] sm:$0xff]  ;;  %v603_v50 = vadd.f32 -1.0, %v288_v19  ;;  %v604_v51 = vadd.f32 -1.0, %v289_v23  ;;  %v605_v52 = vadd.f32 -1.0, %v290_v24  ;;  %v606_v53 = vadd.f32 -1.0, %v291_v25 }
  0x3c   : > { %v259_v54 = vld [vmem:[%s1022_s19 + $0x50] sm:$0xff]  ;;  %v260_v55 = vld [vmem:[%s1022_s19 + $0x58] sm:$0xff]  ;;  %v607_v56 = vadd.f32 -1.0, %v292_v31  ;;  %v608_v57 = vadd.f32 -1.0, %v293_v32  ;;  %v609_v58 = vadd.f32 -1.0, %v294_v33  ;;  %v610_v59 = vadd.f32 -1.0, %v295_v38 }
  0x3d   : > { %v261_v60 = vld [vmem:[%s1022_s19 + $0x60] sm:$0xff]  ;;  %v262_v61 = vld [vmem:[%s1022_s19 + $0x68] sm:$0xff]  ;;  %v263_v62 = vld [vmem:[%s1022_s19 + $0x70] sm:$0xff]  ;;  %v611_v63 = vadd.f32 -1.0, %v296_v39  ;;  %v313_v0 = vmul.f32 %v596_v34, %v249_v26  ;;  %v314_v1 = vmul.f32 %v597_v40, %v250_v27  ;;  %v315_v2 = vmul.f32 %v598_v41, %v251_v28  ;;  %p613_p6 = scmp.gt.s32.totalorder %s1040_s20, 256 }
  0x3e   : > { %v264_v3 = vld [vmem:[%s1022_s19 + $0x78] sm:$0xff]  ;;  %v316_v4 = vmul.f32 %v599_v44, %v252_v35  ;;  %v317_v5 = vmul.f32 %v600_v45, %v253_v36  ;;  %v318_v6 = vmul.f32 %v601_v46, %v254_v37  ;;  %v319_v7 = vmul.f32 %v602_v47, %v255_v42 }
  0x3f   : > { %v320_v8 = vmul.f32 %v603_v50, %v256_v43  ;;  %v321_v9 = vmul.f32 %v604_v51, %v257_v48  ;;  %v322_v10 = vmul.f32 %v605_v52, %v258_v49  ;;  %v323_v11 = vmul.f32 %v606_v53, %v259_v54 }
  0x40   : > { %v324_v12 = vmul.f32 %v607_v56, %v260_v55  ;;  %v325_v13 = vmul.f32 %v608_v57, %v261_v60  ;;  %v326_v14 = vmul.f32 %v609_v58, %v262_v61  ;;  %v327_v15 = vmul.f32 %v610_v59, %v263_v62 }
  0x41   : > { %v328_v16 = vmul.f32 %v611_v63, %v264_v3  ;;  %v329_v17 = vsub.f32 1.0, %v313_v0  ;;  %v330_v18 = vsub.f32 1.0, %v314_v1  ;;  %v331_v19 = vsub.f32 1.0, %v315_v2 }
  0x42   : > { %v332_v20 = vsub.f32 1.0, %v316_v4  ;;  %v333_v21 = vsub.f32 1.0, %v317_v5  ;;  %v334_v22 = vsub.f32 1.0, %v318_v6  ;;  %v335_v23 = vsub.f32 1.0, %v319_v7 }
  0x43   : > { %v336_v24 = vsub.f32 1.0, %v320_v8  ;;  %v337_v25 = vsub.f32 1.0, %v321_v9  ;;  %v338_v26 = vsub.f32 1.0, %v322_v10  ;;  %v339_v27 = vsub.f32 1.0, %v323_v11 }
  0x44   : > { %v340_v28 = vsub.f32 1.0, %v324_v12  ;;  %v341_v29 = vsub.f32 1.0, %v325_v13  ;;  %v342_v30 = vsub.f32 1.0, %v326_v14  ;;  %v343_v31 = vsub.f32 1.0, %v327_v15 }
  0x45   : > { %v344_v32 = vsub.f32 1.0, %v328_v16  ;;  %v345_v33 = vmax.f32 %v329_v17, 0.0  ;;  %v346_v34 = vmax.f32 %v330_v18, 0.0  ;;  %v347_v35 = vmax.f32 %v331_v19, 0.0  ;;  %367 = sbr.rel (%p613_p6) target bundleno = 107 (0x6b), region = 44 }
  0x46   : > { %v348_v36 = vmax.f32 %v332_v20, 0.0  ;;  %v349_v37 = vmax.f32 %v333_v21, 0.0  ;;  %v350_v38 = vmax.f32 %v334_v22, 0.0  ;;  %v1077_v39 = vmax.f32 %v335_v23, 0.0 }
  0x47   : > { %v1079_v40 = vmax.f32 %v336_v24, 0.0  ;;  %v1081_v41 = vmax.f32 %v337_v25, 0.0  ;;  %v1083_v42 = vmax.f32 %v338_v26, 0.0  ;;  %v1085_v43 = vmax.f32 %v339_v27, 0.0 }
  0x48   : > { %v1087_v44 = vmax.f32 %v340_v28, 0.0  ;;  %v1089_v45 = vmax.f32 %v341_v29, 0.0  ;;  %v1091_v46 = vmax.f32 %v342_v30, 0.0  ;;  %v1093_v47 = vmax.f32 %v343_v31, 0.0 }
  0x49   : > { %v1095_v48 = vmax.f32 %v344_v32, 0.0 }
  0x4a   : > { %v369_v49 = vadd.f32 %v346_v34, %v345_v33  ;;  %v368_v63 = vld [vmem:[%s1042_s25] sm:$0xff] }
  0x4c   : > { %v370_v50 = vadd.f32 %v369_v49, %v347_v35 }
  0x4e   : > { %v371_v51 = vadd.f32 %v370_v50, %v348_v36 }
  0x50   : > { %v372_v52 = vadd.f32 %v371_v51, %v349_v37 }
  0x52   : > { %v373_v53 = vadd.f32 %v372_v52, %v350_v38 }
  0x54   : > { %v374_v54 = vadd.f32 %v373_v53, %v1077_v39 }
  0x56   : > { %v375_v55 = vadd.f32 %v374_v54, %v1079_v40 }
  0x58   : > { %v376_v56 = vadd.f32 %v375_v55, %v1081_v41 }
  0x5a   : > { %v377_v57 = vadd.f32 %v376_v56, %v1083_v42 }
  0x5c   : > { %v378_v58 = vadd.f32 %v377_v57, %v1085_v43 }
  0x5e   : > { %v379_v59 = vadd.f32 %v378_v58, %v1087_v44 }
  0x60   : > { %v380_v60 = vadd.f32 %v379_v59, %v1089_v45 }
  0x62   : > { %v381_v61 = vadd.f32 %v380_v60, %v1091_v46 }
  0x64   : > { %v382_v62 = vadd.f32 %v381_v61, %v1093_v47 }
  0x66   : > { %v383_v0 = vadd.f32 %v382_v62, %v1095_v48 }
  0x68   : > { %v384_v1 = vadd.f32 %v383_v0, %v368_v63 }
  0x6a   : > { %385 = vst [vmem:[%s1042_s25] sm:$0xff] %v384_v1 }
  0x6b PF: > { %p614_p8 = scmp.le.s32.totalorder %s1040_s20, 256 }
  0x6c   : > { %s407_s30 = ssub.s32 (!%p614_p8), 256, %s612_s14 }
  0x6d   : > { %389 = sbr.rel (%p614_p8) target bundleno = 155 (0x9b), region = 48 }
  0x72   : > { %v390_v2 = vlaneseq  ;;  %v408_v5 = vstv %s407_s30  ;;  %v441_v55 = vld [vmem:[%s1042_s25] sm:$0xff] }
  0x74   : > { %v391_v3 = vshrl.u32 %v390_v2, 7 }
  0x76   : > { %v392_v4 = vadd.s32 8, %v391_v3  ;;  %v393_v6 = vadd.s32 16, %v391_v3  ;;  %v394_v7 = vadd.s32 24, %v391_v3  ;;  %vm409_vm0 = vcmp.lt.s32.totalorder %v391_v3, %v408_v5 }
  0x77   : > { %v395_v8 = vadd.s32 32, %v391_v3  ;;  %v425_v9 = vsel %vm409_vm0, %v345_v33, 0.0  ;;  %v396_v11 = vadd.s32 40, %v391_v3  ;;  %v397_v13 = vadd.s32 48, %v391_v3 }
  0x78   : > { %vm410_vm1 = vcmp.lt.s32.totalorder %v392_v4, %v408_v5  ;;  %vm411_vm2 = vcmp.lt.s32.totalorder %v393_v6, %v408_v5  ;;  %vm412_vm3 = vcmp.lt.s32.totalorder %v394_v7, %v408_v5  ;;  %v398_v16 = vadd.s32 56, %v391_v3 }
  0x79   : > { %v426_v10 = vsel %vm410_vm1, %v346_v34, 0.0  ;;  %v427_v12 = vsel %vm411_vm2, %v347_v35, 0.0  ;;  %vm413_vm4 = vcmp.lt.s32.totalorder %v395_v8, %v408_v5  ;;  %v428_v15 = vsel %vm412_vm3, %v348_v36, 0.0 }
  0x7a   : > { %v442_v14 = vadd.f32 %v426_v10, %v425_v9  ;;  %vm414_vm5 = vcmp.lt.s32.totalorder %v396_v11, %v408_v5  ;;  %v429_v18 = vsel %vm413_vm4, %v349_v37, 0.0  ;;  %v399_v19 = vadd.s32 64, %v391_v3 }
  0x7b   : > { %vm415_vm6 = vcmp.lt.s32.totalorder %v397_v13, %v408_v5  ;;  %v430_v21 = vsel %vm414_vm5, %v350_v38, 0.0  ;;  %v400_v22 = vadd.s32 72, %v391_v3  ;;  %vm416_vm7 = vcmp.lt.s32.totalorder %v398_v16, %v408_v5 }
  0x7c   : > { %v443_v17 = vadd.f32 %v442_v14, %v427_v12  ;;  %v431_v24 = vsel %vm415_vm6, %v1077_v39, 0.0  ;;  %v401_v25 = vadd.s32 80, %v391_v3  ;;  %vm417_vm8 = vcmp.lt.s32.totalorder %v399_v19, %v408_v5 }
  0x7d   : > { %v432_v27 = vsel %vm416_vm7, %v1079_v40, 0.0  ;;  %v402_v28 = vadd.s32 88, %v391_v3  ;;  %vm418_vm9 = vcmp.lt.s32.totalorder %v400_v22, %v408_v5  ;;  %v433_v30 = vsel %vm417_vm8, %v1081_v41, 0.0 }
  0x7e   : > { %v444_v20 = vadd.f32 %v443_v17, %v428_v15  ;;  %v403_v31 = vadd.s32 96, %v391_v3  ;;  %vm419_vm10 = vcmp.lt.s32.totalorder %v401_v25, %v408_v5  ;;  %v434_v33 = vsel %vm418_vm9, %v1083_v42, 0.0 }
  0x7f   : > { %v404_v34 = vadd.s32 104, %v391_v3  ;;  %vm420_vm11 = vcmp.lt.s32.totalorder %v402_v28, %v408_v5  ;;  %v435_v36 = vsel %vm419_vm10, %v1085_v43, 0.0  ;;  %v405_v37 = vadd.s32 112, %v391_v3 }
  0x80   : > { %v445_v23 = vadd.f32 %v444_v20, %v429_v18  ;;  %vm421_vm12 = vcmp.lt.s32.totalorder %v403_v31, %v408_v5  ;;  %v436_v39 = vsel %vm420_vm11, %v1087_v44, 0.0  ;;  %v406_v40 = vadd.s32 120, %v391_v3 }
  0x81   : > { %vm422_vm13 = vcmp.lt.s32.totalorder %v404_v34, %v408_v5  ;;  %v437_v49 = vsel %vm421_vm12, %v1089_v45, 0.0  ;;  %vm423_vm14 = vcmp.lt.s32.totalorder %v405_v37, %v408_v5 }
  0x82   : > { %v446_v26 = vadd.f32 %v445_v23, %v430_v21  ;;  %v438_v42 = vsel %vm422_vm13, %v1091_v46, 0.0  ;;  %vm424_vm15 = vcmp.lt.s32.totalorder %v406_v40, %v408_v5  ;;  %v439_v43 = vsel %vm423_vm14, %v1093_v47, 0.0 }
  0x83   : > { %v440_v53 = vsel %vm424_vm15, %v1095_v48, 0.0 }
  0x84   : > { %v447_v29 = vadd.f32 %v446_v26, %v431_v24 }
  0x86   : > { %v448_v32 = vadd.f32 %v447_v29, %v432_v27 }
  0x88   : > { %v449_v35 = vadd.f32 %v448_v32, %v433_v30 }
  0x8a   : > { %v450_v38 = vadd.f32 %v449_v35, %v434_v33 }
  0x8c   : > { %v451_v41 = vadd.f32 %v450_v38, %v435_v36 }
  0x8e   : > { %v452_v50 = vadd.f32 %v451_v41, %v436_v39 }
  0x90   : > { %v453_v51 = vadd.f32 %v452_v50, %v437_v49 }
  0x92   : > { %v454_v52 = vadd.f32 %v453_v51, %v438_v42 }
  0x94   : > { %v455_v54 = vadd.f32 %v454_v52, %v439_v43 }
  0x96   : > { %v456_v44 = vadd.f32 %v455_v54, %v440_v53 }
  0x98   : > { %v457_v56 = vadd.f32 %v456_v44, %v441_v55 }
  0x9a   : > { %458 = vst [vmem:[%s1042_s25] sm:$0xff] %v457_v56 }
  0x9b PF: > { %s616_s5 = sshll.u32 %s877_s15, 3  ;;  %s478_s27 = sshll.u32 %s1042_s25, 4  ;;  %s479_s27 = int_to_ptr.vmem [resolvable:$true] %s478_s27 }
  0x9c   : > { %s476_s22 = scalar_lea.hbm %s1178_s2, %s616_s5  ;;  %s466_s8 = scalar_lea.sflag [#allocation4], %s233_s0 }
  0x9d   : > { %s480_s28 = sshll.u32 %s476_s22, 4  ;;  %s795_s23 = scalar_lea.hbm %s1178_s2, 16  ;;  %s481_s28 = int_to_ptr.hbm [resolvable:$true] %s480_s28 }
  0x9e   : > { %s789_s12 = sshra.s32 %s481_s28, 4  ;;  %s790_s12 = int_to_ptr.hbm [resolvable:$true] %s789_s12 }
  0x9f   : > { %s791_s18 = scalar_lea.hbm %s790_s12, 8  ;;  %p796_p0 = scmp.lt.s32.totalorder %s790_s12, %s1178_s2 }
  0xa0   : > { %p792_p11 = scmp.ne.s32.totalorder %s790_s12, %s791_s18  ;;  %p797_p4 = scmp.lt.s32.totalorder %s795_s23, %s791_s18 }
  0xa1   : > { %v462_v45 = vld [vmem:[%s1042_s25] sm:$0xff] }
  0xa2   : > { %v463_v46 = vmul.f32 3.0517578e-05, %v462_v45  ;;  %p793_p12 = pnand %p792_p11, %p986_p1  ;;  %p798_p5 = por %p797_p4, %p796_p0 }
  0xa4   : > { %464 = vst [vmem:[%s1042_s25] sm:$0xff] %v463_v46  ;;  %p794_p13 = pneg %p793_p12 }
  0xa6   : > { %p799_p7 = pnand %p798_p5, %p794_p13 }
  0xa8   : > { %802 = shalt.err (!%p799_p7)
}
  0xa9   : > { %625 = dma.vmem_to_hbm [thread:$0]  (%p986_p1), %s479_s27, 128, %s481_s28, %s466_s8  }
  0xaa PF: > { %s492_s7 = sand.u32 1, %s853_s9   ;;  %p635_p9 = pnand %p585_p2, %p991_p3 }
  0xab   : > { %s493_s0 = scalar_lea.sflag [#allocation4], %s492_s7 }
  0xac   : > { %p636_p10 = pneg %p635_p9 }
  0xae   : > { %848 = dma.done.wait (%p636_p10), %s493_s0, 128  }
  0xaf   : > { %850 = vsyncadd (%p636_p10), %s493_s0, 4294967168  ;;  %s21_s17 = sadd.s32 1, %s885_s17   ;;  %s1193_s3 = sld [smem:[#allocation11_spill]] }
  0xb0   : > { %p18_p6 = scmp.ge.s32.totalorder %s21_s17, 4   ;;  %s1194_s14 = sld [smem:[#allocation14_spill]] }
  0xb1   : > { %s1195_s15 = sld [smem:[#allocation12_spill]]  ;;  %s1197_s9 = smov %s857_s10 }
  0xb2   : > { %s1196_s16 = sld [smem:[#allocation13_spill]]  ;;  %s1198_s10 = smov %s861_s11 }
  0xb3   : > { %s1199_s11 = smov %s977_s29  ;;  %s1200_s12 = smov %s869_s13 }
  0xb4   :  { %20 = sbr.rel (!%p18_p6) target bundleno = 12 (0xc), region = 102 }
  0xb5   : > { %s1201_s13 = smov %s1193_s3 }
  0xb9   :  { %499 = vsyncpa [#allocation3], 1 }
  0xba   :  { %501 = vsyncpa [#allocation3 + $0x1], 1 }
  0xbb   :  { %502 = vsyncpa [#allocation6], 1 }
  0xbc   :  { %504 = vsyncpa [#allocation6 + $0x1], 1 }
  0xbd   :  { %505 = vsyncpa [#allocation4], 1 }
  0xbe   :  { %507 = vsyncpa [#allocation4 + $0x1], 1 }

</bundles_post_ra>
